<compile_context>
chip_gen: v5e
topology: v5e:2x2
jax: 0.10.0
libtpu: 0.0.40
codegen_flags: <defaults>
</compile_context>

<pallas_src>
import jax
import jax.numpy as jnp
from jax import lax
from jax.experimental import pallas as pl
from jax.experimental.pallas import tpu as pltpu


_LANE = 128      # MXU / vreg lane width
_SUBLANE = 8     # vreg sublane count
_TILE_M = 512    # >=512 rows amortizes per-step overhead (~85%+ HBM roofline)


def _round_up(x, m):
    return (x + m - 1) // m * m


# ----------------------------- Pallas kernel ------------------------------ #
def _cbr_matmul_kernel(x_ref, w_ref, bias_ref, o_ref):
    # x_ref:    (TILE_M, Kp)  bf16 im2col patches (K zero-padded to 128-mult)
    # w_ref:    (Kp, Cout)    bf16 conv weights with BN scale folded in
    # bias_ref: (1, Cout)     f32 folded BN bias
    # o_ref:    (TILE_M, Cout)
    acc = jnp.dot(x_ref[...], w_ref[...], preferred_element_type=jnp.float32)
    y = acc + bias_ref[...]
    o_ref[...] = jnp.maximum(y, 0.0).astype(o_ref.dtype)


def _cbr_pallas(patches, wmat, bias, out_dtype):
    """patches: (Mp, Kp) bf16, wmat: (Kp, Cout) bf16, bias: (Cout,) f32."""
    Mp, Kp = patches.shape
    Cout = wmat.shape[1]
    tile_m = min(_TILE_M, Mp)     # Mp is padded to a multiple of tile_m
    grid_m = Mp // tile_m
    return pl.pallas_call(
        _cbr_matmul_kernel,
        out_shape=jax.ShapeDtypeStruct((Mp, Cout), out_dtype),
        grid=(grid_m,),
        in_specs=[
            pl.BlockSpec((tile_m, Kp), lambda i: (i, 0)),   # M-tiled patches
            pl.BlockSpec((Kp, Cout), lambda i: (0, 0)),     # resident weights
            pl.BlockSpec((1, Cout), lambda i: (0, 0)),      # resident bias
        ],
        out_specs=pl.BlockSpec((tile_m, Cout), lambda i: (i, 0)),
        compiler_params=pltpu.CompilerParams(
            dimension_semantics=("parallel",)),             # megacore on v7x
    )(patches, wmat, bias.reshape(1, Cout))


# ------------------------------- JAX glue ---------------------------------- #
def _im2col_s2p1k3(x_nhwc):
    """im2col for kernel=3, stride=2, pad=1.  Returns ((N*Ho*Wo, 9*C), Ho, Wo)."""
    N, H, W, C = x_nhwc.shape
    ksize, stride, pad = 3, 2, 1
    Ho = (H + 2 * pad - ksize) // stride + 1
    Wo = (W + 2 * pad - ksize) // stride + 1
    xp = jnp.pad(x_nhwc, ((0, 0), (pad, pad), (pad, pad), (0, 0)))
    cols = []
    for kh in range(ksize):
        for kw in range(ksize):
            patch = xp[:, kh:kh + stride * (Ho - 1) + 1:stride,
                          kw:kw + stride * (Wo - 1) + 1:stride, :]
            cols.append(patch)
    patches = jnp.concatenate(cols, axis=-1)            # (N, Ho, Wo, 9*C)
    return patches.reshape(N * Ho * Wo, 9 * C), Ho, Wo


def conv_bn_relu(x_nhwc, weight_oihw, gamma, beta, run_mean, run_var,
                 eps=1e-5, out_dtype=jnp.float32):
    """One ConvBatchNormRelu block (k=3, s=2, p=1, bias=False, eval BN)."""
    N = x_nhwc.shape[0]
    Cout, Cin, _, _ = weight_oihw.shape
    patches, Ho, Wo = _im2col_s2p1k3(x_nhwc)
    M, K = patches.shape

    # K padded to MXU lane width; M padded so every grid step is a full block.
    Kp = _round_up(K, _LANE)
    Mp = _round_up(M, _SUBLANE) if M <= _TILE_M else _round_up(M, _TILE_M)
    patches = jnp.pad(patches, ((0, Mp - M), (0, Kp - K))).astype(jnp.bfloat16)

    # Fold BN: scale into the weights (one-time, tiny), bias stays in-kernel.
    scale = gamma / jnp.sqrt(run_var + eps)
    bias = (beta - run_mean * scale).astype(jnp.float32)
    # match im2col K-order (kh, kw, cin): OIHW -> HWIO -> (9*Cin, Cout)
    wmat = jnp.transpose(weight_oihw, (2, 3, 1, 0)).reshape(K, Cout)
    wmat = wmat * scale[None, :]
    wmat = jnp.pad(wmat, ((0, Kp - K), (0, 0))).astype(jnp.bfloat16)

    out = _cbr_pallas(patches, wmat, bias, out_dtype)    # (Mp, Cout)
    return out[:M].reshape(N, Ho, Wo, Cout)


def spatial_path(x_nchw, params):
    """SpatialPath.forward — returns feat_8x in NCHW (matches PyTorch)."""
    x = jnp.transpose(x_nchw, (0, 2, 3, 1)).astype(jnp.bfloat16)  # NCHW->NHWC
    layers = ("cbr1", "cbr2", "cbr3")
    for idx, layer in enumerate(layers):
        p = params[layer]
        out_dtype = jnp.bfloat16 if idx < len(layers) - 1 else jnp.float32
        x = conv_bn_relu(x, p["w"], p["gamma"], p["beta"], p["mean"], p["var"],
                         out_dtype=out_dtype)
    return jnp.transpose(x, (0, 3, 1, 2))                # NHWC -> NCHW


# --------------------------- parameter creation ----------------------------- #
def make_params(key, in_channels=3, sc_channels=128):
    mid = sc_channels // 2
    dims = [(in_channels, mid), (mid, mid), (mid, sc_channels)]
    params = {}
    for idx, (cin, cout) in enumerate(dims, start=1):
        key, k1, k2, k3, k4, k5 = jax.random.split(key, 6)
        fan_in = cin * 9
        params[f"cbr{idx}"] = dict(
            w=jax.random.normal(k1, (cout, cin, 3, 3), jnp.float32)
              * (2.0 / fan_in) ** 0.5,
            gamma=jax.random.uniform(k2, (cout,), jnp.float32, 0.5, 1.5),
            beta=jax.random.normal(k3, (cout,), jnp.float32) * 0.1,
            mean=jax.random.normal(k4, (cout,), jnp.float32) * 0.1,
            var=jax.random.uniform(k5, (cout,), jnp.float32, 0.5, 1.5),
        )
    return params


# ------------------------------ reference ----------------------------------- #
def spatial_path_ref(x_nchw, params, eps=1e-5):
    """Matched-precision reference: lax.conv with the same bf16 operands,
    f32 accumulation, folded-BN weights, and bf16 intermediate activations."""
    x = x_nchw.astype(jnp.bfloat16)
    layers = ("cbr1", "cbr2", "cbr3")
    for idx, layer in enumerate(layers):
        p = params[layer]
        scale = p["gamma"] / jnp.sqrt(p["var"] + eps)
        bias = (p["beta"] - p["mean"] * scale).reshape(1, -1, 1, 1)
        w = (p["w"] * scale[:, None, None, None]).astype(jnp.bfloat16)
        y = lax.conv_general_dilated(
            x, w, window_strides=(2, 2), padding=((1, 1), (1, 1)),
            dimension_numbers=("NCHW", "OIHW", "NCHW"),
            preferred_element_type=jnp.float32)
        y = jnp.maximum(y + bias, 0.0)
        x = y.astype(jnp.bfloat16) if idx < len(layers) - 1 else y
    return x


if __name__ == "__main__":
    key = jax.random.PRNGKey(0)
    kx, kp = jax.random.split(key)

    # small example consistent with the module: N=2, Cin=3, H=W=16
    x = jax.random.normal(kx, (2, 3, 16, 16), jnp.float32)
    params = make_params(kp, in_channels=3, sc_channels=128)

    out = jax.block_until_ready(jax.jit(spatial_path)(x, params))
    assert out.shape == (2, 128, 2, 2), out.shape
    assert out.dtype == jnp.float32, out.dtype

    ref = jax.block_until_ready(spatial_path_ref(x, params))
    max_err = float(jnp.max(jnp.abs(out - ref)))
    assert jnp.allclose(out, ref, rtol=1e-2, atol=1e-2), max_err

    print("KERNEL_OK")
</pallas_src>

<mosaic_0001>
module attributes {stable_mosaic.version = 11 : i64} {
  func.func @_cbr_matmul_kernel(%arg0: i32, %arg1: memref<128x128xbf16, #tpu.memory_space<vmem>>, %arg2: memref<128x64xbf16, #tpu.memory_space<vmem>>, %arg3: memref<1x64xf32, #tpu.memory_space<vmem>>, %arg4: memref<128x64xbf16, #tpu.memory_space<vmem>>) attributes {dimension_semantics = [#tpu.dimension_semantics<parallel>], iteration_bounds = array<i64: 1>, scalar_prefetch = 0 : i64, scratch_operands = 0 : i64, tpu.core_type = #tpu.core_type<tc>, window_params = [{transform_indices = @transform_0, window_bounds = array<i64: 128, 128>}, {pipeline_mode = #tpu.pipeline_mode<synchronous>, transform_indices = @transform_1, window_bounds = array<i64: 128, 64>}, {pipeline_mode = #tpu.pipeline_mode<synchronous>, transform_indices = @transform_2, window_bounds = array<i64: 1, 64>}, {transform_indices = @transform_3, window_bounds = array<i64: 128, 64>}]} {
    %c0 = arith.constant 0 : index
    %c0_0 = arith.constant 0 : index
    %0 = vector.load %arg1[%c0, %c0_0] : memref<128x128xbf16, #tpu.memory_space<vmem>>, vector<128x128xbf16>
    %c0_1 = arith.constant 0 : index
    %c0_2 = arith.constant 0 : index
    %1 = vector.load %arg2[%c0_1, %c0_2] : memref<128x64xbf16, #tpu.memory_space<vmem>>, vector<128x64xbf16>
    %cst = arith.constant dense<0.000000e+00> : vector<128x64xf32>
    %2 = tpu.matmul %0, %1, %cst {dimension_numbers = #tpu.dot_dimension_numbers<[1], [0], [0], [1], [0, 0, 1, 1], [], []>} : vector<128x128xbf16>, vector<128x64xbf16>, vector<128x64xf32> -> vector<128x64xf32>
    %c0_3 = arith.constant 0 : index
    %c0_4 = arith.constant 0 : index
    %3 = vector.load %arg3[%c0_3, %c0_4] : memref<1x64xf32, #tpu.memory_space<vmem>>, vector<1x64xf32>
    %4 = vector.broadcast %3 : vector<1x64xf32> to vector<128x64xf32>
    %5 = arith.addf %2, %4 : vector<128x64xf32>
    %cst_5 = arith.constant 0.000000e+00 : f32
    %6 = vector.broadcast %cst_5 : f32 to vector<128x64xf32>
    %7 = arith.maximumf %5, %6 : vector<128x64xf32>
    %8 = arith.truncf %7 : vector<128x64xf32> to vector<128x64xbf16>
    %c0_6 = arith.constant 0 : index
    %c0_7 = arith.constant 0 : index
    %9 = vector.load %arg4[%c0_6, %c0_7] : memref<128x64xbf16, #tpu.memory_space<vmem>>, vector<128x64xbf16>
    tpu.vector_store %arg4[%c0_6, %c0_7], %8 {strides = array<i32>} : memref<128x64xbf16, #tpu.memory_space<vmem>>, vector<128x64xbf16>,
    return
  }
  func.func @transform_0(%arg0: i32) -> (i32, i32) {
    %c0_i32 = arith.constant 0 : i32
    %c0_i32_0 = arith.constant 0 : i32
    return %arg0, %c0_i32 : i32, i32
  }
  func.func @transform_1(%arg0: i32) -> (i32, i32) {
    %c0_i32 = arith.constant 0 : i32
    %c0_i32_0 = arith.constant 0 : i32
    %c0_i32_1 = arith.constant 0 : i32
    return %c0_i32, %c0_i32_0 : i32, i32
  }
  func.func @transform_2(%arg0: i32) -> (i32, i32) {
    %c0_i32 = arith.constant 0 : i32
    %c0_i32_0 = arith.constant 0 : i32
    %c0_i32_1 = arith.constant 0 : i32
    return %c0_i32, %c0_i32_0 : i32, i32
  }
  func.func @transform_3(%arg0: i32) -> (i32, i32) {
    %c0_i32 = arith.constant 0 : i32
    %c0_i32_0 = arith.constant 0 : i32
    return %arg0, %c0_i32 : i32, i32
  }
}

module attributes {stable_mosaic.version = 11 : i64} {
  func.func @_cbr_matmul_kernel(%arg0: i32, %arg1: memref<32x640xbf16, #tpu.memory_space<vmem>>, %arg2: memref<640x64xbf16, #tpu.memory_space<vmem>>, %arg3: memref<1x64xf32, #tpu.memory_space<vmem>>, %arg4: memref<32x64xbf16, #tpu.memory_space<vmem>>) attributes {dimension_semantics = [#tpu.dimension_semantics<parallel>], iteration_bounds = array<i64: 1>, scalar_prefetch = 0 : i64, scratch_operands = 0 : i64, tpu.core_type = #tpu.core_type<tc>, window_params = [{transform_indices = @transform_0, window_bounds = array<i64: 32, 640>}, {pipeline_mode = #tpu.pipeline_mode<synchronous>, transform_indices = @transform_1, window_bounds = array<i64: 640, 64>}, {pipeline_mode = #tpu.pipeline_mode<synchronous>, transform_indices = @transform_2, window_bounds = array<i64: 1, 64>}, {transform_indices = @transform_3, window_bounds = array<i64: 32, 64>}]} {
    %c0 = arith.constant 0 : index
    %c0_0 = arith.constant 0 : index
    %0 = vector.load %arg1[%c0, %c0_0] : memref<32x640xbf16, #tpu.memory_space<vmem>>, vector<32x640xbf16>
    %c0_1 = arith.constant 0 : index
    %c0_2 = arith.constant 0 : index
    %1 = vector.load %arg2[%c0_1, %c0_2] : memref<640x64xbf16, #tpu.memory_space<vmem>>, vector<640x64xbf16>
    %cst = arith.constant dense<0.000000e+00> : vector<32x64xf32>
    %2 = tpu.matmul %0, %1, %cst {dimension_numbers = #tpu.dot_dimension_numbers<[1], [0], [0], [1], [0, 0, 1, 1], [], []>} : vector<32x640xbf16>, vector<640x64xbf16>, vector<32x64xf32> -> vector<32x64xf32>
    %c0_3 = arith.constant 0 : index
    %c0_4 = arith.constant 0 : index
    %3 = vector.load %arg3[%c0_3, %c0_4] : memref<1x64xf32, #tpu.memory_space<vmem>>, vector<1x64xf32>
    %4 = vector.broadcast %3 : vector<1x64xf32> to vector<32x64xf32>
    %5 = arith.addf %2, %4 : vector<32x64xf32>
    %cst_5 = arith.constant 0.000000e+00 : f32
    %6 = vector.broadcast %cst_5 : f32 to vector<32x64xf32>
    %7 = arith.maximumf %5, %6 : vector<32x64xf32>
    %8 = arith.truncf %7 : vector<32x64xf32> to vector<32x64xbf16>
    %c0_6 = arith.constant 0 : index
    %c0_7 = arith.constant 0 : index
    %9 = vector.load %arg4[%c0_6, %c0_7] : memref<32x64xbf16, #tpu.memory_space<vmem>>, vector<32x64xbf16>
    tpu.vector_store %arg4[%c0_6, %c0_7], %8 {strides = array<i32>} : memref<32x64xbf16, #tpu.memory_space<vmem>>, vector<32x64xbf16>,
    return
  }
  func.func @transform_0(%arg0: i32) -> (i32, i32) {
    %c0_i32 = arith.constant 0 : i32
    %c0_i32_0 = arith.constant 0 : i32
    return %arg0, %c0_i32 : i32, i32
  }
  func.func @transform_1(%arg0: i32) -> (i32, i32) {
    %c0_i32 = arith.constant 0 : i32
    %c0_i32_0 = arith.constant 0 : i32
    %c0_i32_1 = arith.constant 0 : i32
    return %c0_i32, %c0_i32_0 : i32, i32
  }
  func.func @transform_2(%arg0: i32) -> (i32, i32) {
    %c0_i32 = arith.constant 0 : i32
    %c0_i32_0 = arith.constant 0 : i32
    %c0_i32_1 = arith.constant 0 : i32
    return %c0_i32, %c0_i32_0 : i32, i32
  }
  func.func @transform_3(%arg0: i32) -> (i32, i32) {
    %c0_i32 = arith.constant 0 : i32
    %c0_i32_0 = arith.constant 0 : i32
    return %arg0, %c0_i32 : i32, i32
  }
}

module attributes {stable_mosaic.version = 11 : i64} {
  func.func @_cbr_matmul_kernel(%arg0: i32, %arg1: memref<8x640xbf16, #tpu.memory_space<vmem>>, %arg2: memref<640x128xbf16, #tpu.memory_space<vmem>>, %arg3: memref<1x128xf32, #tpu.memory_space<vmem>>, %arg4: memref<8x128xf32, #tpu.memory_space<vmem>>) attributes {dimension_semantics = [#tpu.dimension_semantics<parallel>], iteration_bounds = array<i64: 1>, scalar_prefetch = 0 : i64, scratch_operands = 0 : i64, tpu.core_type = #tpu.core_type<tc>, window_params = [{transform_indices = @transform_0, window_bounds = array<i64: 8, 640>}, {pipeline_mode = #tpu.pipeline_mode<synchronous>, transform_indices = @transform_1, window_bounds = array<i64: 640, 128>}, {pipeline_mode = #tpu.pipeline_mode<synchronous>, transform_indices = @transform_2, window_bounds = array<i64: 1, 128>}, {transform_indices = @transform_3, window_bounds = array<i64: 8, 128>}]} {
    %c0 = arith.constant 0 : index
    %c0_0 = arith.constant 0 : index
    %0 = vector.load %arg1[%c0, %c0_0] : memref<8x640xbf16, #tpu.memory_space<vmem>>, vector<8x640xbf16>
    %c0_1 = arith.constant 0 : index
    %c0_2 = arith.constant 0 : index
    %1 = vector.load %arg2[%c0_1, %c0_2] : memref<640x128xbf16, #tpu.memory_space<vmem>>, vector<640x128xbf16>
    %cst = arith.constant dense<0.000000e+00> : vector<8x128xf32>
    %2 = tpu.matmul %0, %1, %cst {dimension_numbers = #tpu.dot_dimension_numbers<[1], [0], [0], [1], [0, 0, 1, 1], [], []>} : vector<8x640xbf16>, vector<640x128xbf16>, vector<8x128xf32> -> vector<8x128xf32>
    %c0_3 = arith.constant 0 : index
    %c0_4 = arith.constant 0 : index
    %3 = vector.load %arg3[%c0_3, %c0_4] : memref<1x128xf32, #tpu.memory_space<vmem>>, vector<1x128xf32>
    %4 = vector.broadcast %3 : vector<1x128xf32> to vector<8x128xf32>
    %5 = arith.addf %2, %4 : vector<8x128xf32>
    %cst_5 = arith.constant 0.000000e+00 : f32
    %6 = vector.broadcast %cst_5 : f32 to vector<8x128xf32>
    %7 = arith.maximumf %5, %6 : vector<8x128xf32>
    %c0_6 = arith.constant 0 : index
    %c0_7 = arith.constant 0 : index
    %8 = vector.load %arg4[%c0_6, %c0_7] : memref<8x128xf32, #tpu.memory_space<vmem>>, vector<8x128xf32>
    tpu.vector_store %arg4[%c0_6, %c0_7], %7 {strides = array<i32>} : memref<8x128xf32, #tpu.memory_space<vmem>>, vector<8x128xf32>,
    return
  }
  func.func @transform_0(%arg0: i32) -> (i32, i32) {
    %c0_i32 = arith.constant 0 : i32
    %c0_i32_0 = arith.constant 0 : i32
    return %arg0, %c0_i32 : i32, i32
  }
  func.func @transform_1(%arg0: i32) -> (i32, i32) {
    %c0_i32 = arith.constant 0 : i32
    %c0_i32_0 = arith.constant 0 : i32
    %c0_i32_1 = arith.constant 0 : i32
    return %c0_i32, %c0_i32_0 : i32, i32
  }
  func.func @transform_2(%arg0: i32) -> (i32, i32) {
    %c0_i32 = arith.constant 0 : i32
    %c0_i32_0 = arith.constant 0 : i32
    %c0_i32_1 = arith.constant 0 : i32
    return %c0_i32, %c0_i32_0 : i32, i32
  }
  func.func @transform_3(%arg0: i32) -> (i32, i32) {
    %c0_i32 = arith.constant 0 : i32
    %c0_i32_0 = arith.constant 0 : i32
    return %arg0, %c0_i32 : i32, i32
  }
}

</mosaic_0001>

<bundles_post_ra>
// kernel: spatial_path.3
= control target key start
LH: loop header
LB: loop body
LE: loop exit
PB: predicated region body
PF: predicated region fallthrough
CT: control target
= control target key end

     0   :  { %vm227_vm0 = vcmask 519168   ;;  %s506_s1 = inlined_call_operand.vmem [shape: bf16[128,64], index: 1, kind: input, shape index: {}]   ;;  %s507_s2 = inlined_call_operand.vmem [shape: f32[1,64], index: 2, kind: input, shape index: {}]   ;;  %s508_s0 = inlined_call_operand.vmem [shape: bf16[128,128], index: 0, kind: input, shape index: {}]   ;;  %s509_s3 = inlined_call_operand.vmem [shape: bf16[128,64], index: 3, kind: output, shape index: {}]  }
   0x1   :  { %v327_v0 = vld [vmem:[%s506_s1 + $0x38] sm:$0xff]  ;;  %v326_v1 = vld [vmem:[%s506_s1 + $0x30] sm:$0xff]  ;;  %v325_v2 = vld [vmem:[%s506_s1 + $0x28] sm:$0xff] }
   0x2   :  { %146 = vmatpush.bf16.msra.mxu0 %v327_v0  ;;  %328 = vmatpush.bf16.msra.mxu1 %v327_v0  ;;  %v324_v3 = vld [vmem:[%s506_s1 + $0x20] sm:$0xff]  ;;  %v323_v4 = vld [vmem:[%s506_s1 + $0x18] sm:$0xff]  ;;  %v322_v5 = vld [vmem:[%s506_s1 + $0x10] sm:$0xff] }
   0x3   :  { %329 = vmatpush.bf16.msra.mxu2 %v327_v0  ;;  %330 = vmatpush.bf16.msra.mxu3 %v327_v0  ;;  %v321_v6 = vld [vmem:[%s506_s1 + $0x8] sm:$0xff]  ;;  %v320_v7 = vld [vmem:[%s506_s1] sm:$0xff]  ;;  %v314_v9 = vld [vmem:[%s508_s0 + $0x10] sm:$0xff] }
   0x4   :  { %v312_v8 = vld [vmem:[%s508_s0] sm:$0xff]  ;;  %v318_v11 = vld [vmem:[%s508_s0 + $0x30] sm:$0xff]  ;;  %v313_v12 = vld [vmem:[%s508_s0 + $0x8] sm:$0xff] }
   0x5   :  { %v316_v10 = vld [vmem:[%s508_s0 + $0x20] sm:$0xff]  ;;  %v315_v13 = vld [vmem:[%s508_s0 + $0x18] sm:$0xff]  ;;  %v317_v14 = vld [vmem:[%s508_s0 + $0x28] sm:$0xff] }
   0x6   :  { %147 = vmatpush.bf16.msra.mxu0 %v326_v1  ;;  %331 = vmatpush.bf16.msra.mxu1 %v326_v1  ;;  %v319_v15 = vld [vmem:[%s508_s0 + $0x38] sm:$0xff]  ;;  %v424_v16 = vld [vmem:[%s507_s2] ss:$0 sm:$0xff] }
   0x7   :  { %332 = vmatpush.bf16.msra.mxu2 %v326_v1  ;;  %333 = vmatpush.bf16.msra.mxu3 %v326_v1 }
   0xa   :  { %148 = vmatpush.bf16.msra.mxu0 %v325_v2  ;;  %334 = vmatpush.bf16.msra.mxu1 %v325_v2 }
   0xb   :  { %335 = vmatpush.bf16.msra.mxu2 %v325_v2  ;;  %336 = vmatpush.bf16.msra.mxu3 %v325_v2 }
   0xe   :  { %149 = vmatpush.bf16.msra.mxu0 %v324_v3  ;;  %337 = vmatpush.bf16.msra.mxu1 %v324_v3 }
   0xf   :  { %338 = vmatpush.bf16.msra.mxu2 %v324_v3  ;;  %339 = vmatpush.bf16.msra.mxu3 %v324_v3 }
  0x12   :  { %150 = vmatpush.bf16.msra.mxu0 %v323_v4  ;;  %340 = vmatpush.bf16.msra.mxu1 %v323_v4 }
  0x13   :  { %341 = vmatpush.bf16.msra.mxu2 %v323_v4  ;;  %342 = vmatpush.bf16.msra.mxu3 %v323_v4 }
  0x16   :  { %151 = vmatpush.bf16.msra.mxu0 %v322_v5  ;;  %343 = vmatpush.bf16.msra.mxu1 %v322_v5 }
  0x17   :  { %344 = vmatpush.bf16.msra.mxu2 %v322_v5  ;;  %345 = vmatpush.bf16.msra.mxu3 %v322_v5 }
  0x1a   :  { %152 = vmatpush.bf16.msra.mxu0 %v321_v6  ;;  %346 = vmatpush.bf16.msra.mxu1 %v321_v6 }
  0x1b   :  { %347 = vmatpush.bf16.msra.mxu2 %v321_v6  ;;  %348 = vmatpush.bf16.msra.mxu3 %v321_v6 }
  0x1e   :  { %153 = vmatpush.bf16.msra.mxu0 %v320_v7  ;;  %349 = vmatpush.bf16.msra.mxu1 %v320_v7 }
  0x1f   :  { %350 = vmatpush.bf16.msra.mxu2 %v320_v7  ;;  %351 = vmatpush.bf16.msra.mxu3 %v320_v7 }
  0x21   :  { %154 = vmatmul.bf16.vlgmr.msra.gmra.mxu0 %v312_v8  ;;  %164 = vmatmul.bf16.vlgmr.msra.gmra.mxu1 %v314_v9 }
  0x22   :  { %174 = vmatmul.bf16.vlgmr.msra.gmra.mxu2 %v316_v10  ;;  %184 = vmatmul.bf16.vlgmr.msra.gmra.mxu3 %v318_v11 }
  0x31   :  { %159 = vmatmul.bf16.gmra.mxu0 %v313_v12  ;;  %169 = vmatmul.bf16.gmra.mxu1 %v315_v13 }
  0x32   :  { %179 = vmatmul.bf16.gmra.mxu2 %v317_v14  ;;  %189 = vmatmul.bf16.gmra.mxu3 %v319_v15 }
  0x9e   :  { %v155_v17 = vpop.f32.mrf.mxu0  ;;  %v165_v18 = vpop.f32.mrf.mxu1 }
  0x9f   :  { %v156_v19 = vadd.f32 %v424_v16, %v155_v17  ;;  %v166_v20 = vadd.f32 %v424_v16, %v165_v18 }
  0xa1   :  { %v195_v21 = vmax.f32 %v156_v19, 0.0  ;;  %v199_v22 = vmax.f32 %v166_v20, 0.0 }
  0xa3   :  { %v211_v23 = vpack.c.bf16 %v195_v21, %v195_v21  ;;  %v215_v24 = vpack.c.bf16 %v199_v22, %v199_v22 }
  0xa5   :  { %228 = vst.msk [vmem:[%s509_s3] sm:$0xf] %vm227_vm0, %v211_v23  ;;  %v175_v25 = vpop.f32.mrf.mxu2  ;;  %v185_v26 = vpop.f32.mrf.mxu3 }
  0xa6   :  { %232 = vst.msk [vmem:[%s509_s3 + $0x10] sm:$0xf] %vm227_vm0, %v215_v24  ;;  %v176_v27 = vadd.f32 %v424_v16, %v175_v25  ;;  %v186_v28 = vadd.f32 %v424_v16, %v185_v26  ;;  %v157_v29 = vpop.f32.mrf.mxu0  ;;  %v167_v30 = vpop.f32.mrf.mxu1 }
  0xa7   :  { %v158_v31 = vadd.f32 %v424_v16, %v157_v29  ;;  %v168_v32 = vadd.f32 %v424_v16, %v167_v30 }
  0xa8   :  { %v203_v33 = vmax.f32 %v176_v27, 0.0  ;;  %v207_v34 = vmax.f32 %v186_v28, 0.0 }
  0xa9   :  { %v196_v35 = vmax.f32 %v158_v31, 0.0  ;;  %v200_v36 = vmax.f32 %v168_v32, 0.0 }
  0xaa   :  { %v219_v37 = vpack.c.bf16 %v203_v33, %v203_v33  ;;  %v223_v38 = vpack.c.bf16 %v207_v34, %v207_v34 }
  0xab   :  { %v212_v39 = vpack.c.bf16 %v196_v35, %v196_v35  ;;  %v216_v40 = vpack.c.bf16 %v200_v36, %v200_v36 }
  0xac   :  { %236 = vst.msk [vmem:[%s509_s3 + $0x20] sm:$0xf] %vm227_vm0, %v219_v37 }
  0xad   :  { %240 = vst.msk [vmem:[%s509_s3 + $0x30] sm:$0xf] %vm227_vm0, %v223_v38  ;;  %v177_v41 = vpop.f32.mrf.mxu2  ;;  %v187_v42 = vpop.f32.mrf.mxu3 }
  0xae   :  { %229 = vst.msk [vmem:[%s509_s3 + $0x4] sm:$0xf] %vm227_vm0, %v212_v39  ;;  %v178_v43 = vadd.f32 %v424_v16, %v177_v41  ;;  %v188_v44 = vadd.f32 %v424_v16, %v187_v42  ;;  %v160_v45 = vpop.f32.mrf.mxu0  ;;  %v170_v46 = vpop.f32.mrf.mxu1 }
  0xaf   :  { %233 = vst.msk [vmem:[%s509_s3 + $0x14] sm:$0xf] %vm227_vm0, %v216_v40  ;;  %v161_v47 = vadd.f32 %v424_v16, %v160_v45  ;;  %v171_v48 = vadd.f32 %v424_v16, %v170_v46 }
  0xb0   :  { %v204_v49 = vmax.f32 %v178_v43, 0.0  ;;  %v208_v50 = vmax.f32 %v188_v44, 0.0 }
  0xb1   :  { %v197_v51 = vmax.f32 %v161_v47, 0.0  ;;  %v201_v52 = vmax.f32 %v171_v48, 0.0 }
  0xb2   :  { %v220_v53 = vpack.c.bf16 %v204_v49, %v204_v49  ;;  %v224_v54 = vpack.c.bf16 %v208_v50, %v208_v50 }
  0xb3   :  { %v213_v55 = vpack.c.bf16 %v197_v51, %v197_v51  ;;  %v217_v56 = vpack.c.bf16 %v201_v52, %v201_v52 }
  0xb4   :  { %237 = vst.msk [vmem:[%s509_s3 + $0x24] sm:$0xf] %vm227_vm0, %v220_v53 }
  0xb5   :  { %241 = vst.msk [vmem:[%s509_s3 + $0x34] sm:$0xf] %vm227_vm0, %v224_v54  ;;  %v180_v57 = vpop.f32.mrf.mxu2  ;;  %v190_v58 = vpop.f32.mrf.mxu3 }
  0xb6   :  { %230 = vst.msk [vmem:[%s509_s3 + $0x8] sm:$0xf] %vm227_vm0, %v213_v55  ;;  %v181_v59 = vadd.f32 %v424_v16, %v180_v57  ;;  %v191_v60 = vadd.f32 %v424_v16, %v190_v58  ;;  %v162_v61 = vpop.f32.mrf.mxu0  ;;  %v172_v62 = vpop.f32.mrf.mxu1 }
  0xb7   :  { %234 = vst.msk [vmem:[%s509_s3 + $0x18] sm:$0xf] %vm227_vm0, %v217_v56  ;;  %v163_v63 = vadd.f32 %v424_v16, %v162_v61  ;;  %v173_v0 = vadd.f32 %v424_v16, %v172_v62 }
  0xb8   :  { %v205_v1 = vmax.f32 %v181_v59, 0.0  ;;  %v209_v2 = vmax.f32 %v191_v60, 0.0 }
  0xb9   :  { %v198_v3 = vmax.f32 %v163_v63, 0.0  ;;  %v202_v4 = vmax.f32 %v173_v0, 0.0 }
  0xba   :  { %v221_v5 = vpack.c.bf16 %v205_v1, %v205_v1  ;;  %v225_v6 = vpack.c.bf16 %v209_v2, %v209_v2 }
  0xbb   :  { %v214_v7 = vpack.c.bf16 %v198_v3, %v198_v3  ;;  %v218_v8 = vpack.c.bf16 %v202_v4, %v202_v4 }
  0xbc   :  { %238 = vst.msk [vmem:[%s509_s3 + $0x28] sm:$0xf] %vm227_vm0, %v221_v5 }
  0xbd   :  { %242 = vst.msk [vmem:[%s509_s3 + $0x38] sm:$0xf] %vm227_vm0, %v225_v6  ;;  %v182_v9 = vpop.f32.mrf.mxu2  ;;  %v192_v10 = vpop.f32.mrf.mxu3 }
  0xbe   :  { %231 = vst.msk [vmem:[%s509_s3 + $0xc] sm:$0xf] %vm227_vm0, %v214_v7  ;;  %v183_v11 = vadd.f32 %v424_v16, %v182_v9  ;;  %v193_v12 = vadd.f32 %v424_v16, %v192_v10 }
  0xbf   :  { %235 = vst.msk [vmem:[%s509_s3 + $0x1c] sm:$0xf] %vm227_vm0, %v218_v8 }
  0xc0   :  { %v206_v13 = vmax.f32 %v183_v11, 0.0  ;;  %v210_v14 = vmax.f32 %v193_v12, 0.0 }
  0xc2   :  { %v222_v15 = vpack.c.bf16 %v206_v13, %v206_v13  ;;  %v226_v17 = vpack.c.bf16 %v210_v14, %v210_v14 }
  0xc4   :  { %239 = vst.msk [vmem:[%s509_s3 + $0x2c] sm:$0xf] %vm227_vm0, %v222_v15 }
  0xc5   :  { %243 = vst.msk [vmem:[%s509_s3 + $0x3c] sm:$0xf] %vm227_vm0, %v226_v17 }

// kernel: spatial_path.4
= control target key start
LH: loop header
LB: loop body
LE: loop exit
PB: predicated region body
PF: predicated region fallthrough
CT: control target
= control target key end

     0   :  { %vm505_vm0 = vcmask 519168   ;;  %s992_s1 = inlined_call_operand.vmem [shape: bf16[640,64], index: 1, kind: input, shape index: {}]   ;;  %s993_s2 = inlined_call_operand.vmem [shape: f32[1,64], index: 2, kind: input, shape index: {}]   ;;  %s994_s0 = inlined_call_operand.vmem [shape: bf16[32,640], index: 0, kind: input, shape index: {}]   ;;  %s995_s3 = inlined_call_operand.vmem [shape: bf16[32,64], index: 3, kind: output, shape index: {}]  }
   0x1   :  { %v731_v0 = vld [vmem:[%s992_s1 + $0x38] sm:$0xff]  ;;  %v730_v4 = vld [vmem:[%s992_s1 + $0x30] sm:$0xff]  ;;  %v729_v8 = vld [vmem:[%s992_s1 + $0x28] sm:$0xff] }
   0x2   :  { %v739_v1 = vld [vmem:[%s992_s1 + $0x78] sm:$0xff]  ;;  %402 = vmatpush.bf16.msra.mxu0 %v731_v0  ;;  %v738_v5 = vld [vmem:[%s992_s1 + $0x70] sm:$0xff]  ;;  %v737_v9 = vld [vmem:[%s992_s1 + $0x68] sm:$0xff] }
   0x3   :  { %v747_v2 = vld [vmem:[%s992_s1 + $0xb8] sm:$0xff]  ;;  %421 = vmatpush.bf16.msra.mxu1 %v739_v1  ;;  %v746_v6 = vld [vmem:[%s992_s1 + $0xb0] sm:$0xff]  ;;  %v745_v10 = vld [vmem:[%s992_s1 + $0xa8] sm:$0xff] }
   0x4   :  { %v755_v3 = vld [vmem:[%s992_s1 + $0xf8] sm:$0xff]  ;;  %440 = vmatpush.bf16.msra.mxu2 %v747_v2  ;;  %v754_v7 = vld [vmem:[%s992_s1 + $0xf0] sm:$0xff]  ;;  %v753_v11 = vld [vmem:[%s992_s1 + $0xe8] sm:$0xff] }
   0x5   :  { %459 = vmatpush.bf16.msra.mxu3 %v755_v3  ;;  %v728_v12 = vld [vmem:[%s992_s1 + $0x20] sm:$0xff]  ;;  %v727_v16 = vld [vmem:[%s992_s1 + $0x18] sm:$0xff]  ;;  %v726_v20 = vld [vmem:[%s992_s1 + $0x10] sm:$0xff] }
   0x6   :  { %403 = vmatpush.bf16.msra.mxu0 %v730_v4  ;;  %v736_v13 = vld [vmem:[%s992_s1 + $0x60] sm:$0xff]  ;;  %v735_v17 = vld [vmem:[%s992_s1 + $0x58] sm:$0xff]  ;;  %v734_v21 = vld [vmem:[%s992_s1 + $0x50] sm:$0xff] }
   0x7   :  { %422 = vmatpush.bf16.msra.mxu1 %v738_v5  ;;  %v744_v14 = vld [vmem:[%s992_s1 + $0xa0] sm:$0xff]  ;;  %v743_v18 = vld [vmem:[%s992_s1 + $0x98] sm:$0xff]  ;;  %v742_v22 = vld [vmem:[%s992_s1 + $0x90] sm:$0xff] }
   0x8   :  { %441 = vmatpush.bf16.msra.mxu2 %v746_v6  ;;  %v752_v15 = vld [vmem:[%s992_s1 + $0xe0] sm:$0xff]  ;;  %v751_v19 = vld [vmem:[%s992_s1 + $0xd8] sm:$0xff]  ;;  %v750_v23 = vld [vmem:[%s992_s1 + $0xd0] sm:$0xff] }
   0x9   :  { %460 = vmatpush.bf16.msra.mxu3 %v754_v7  ;;  %v725_v24 = vld [vmem:[%s992_s1 + $0x8] sm:$0xff]  ;;  %v724_v28 = vld [vmem:[%s992_s1] sm:$0xff]  ;;  %v716_v33 = vld [vmem:[%s994_s0 + $0x10] sm:$0xf0] }
   0xa   :  { %404 = vmatpush.bf16.msra.mxu0 %v729_v8  ;;  %v733_v25 = vld [vmem:[%s992_s1 + $0x48] sm:$0xff]  ;;  %v732_v29 = vld [vmem:[%s992_s1 + $0x40] sm:$0xff]  ;;  %v518_v35 = vld [vmem:[%s994_s0 + $0x14] sm:$0xf0] }
   0xb   :  { %423 = vmatpush.bf16.msra.mxu1 %v737_v9  ;;  %v741_v26 = vld [vmem:[%s992_s1 + $0x88] sm:$0xff]  ;;  %v740_v30 = vld [vmem:[%s992_s1 + $0x80] sm:$0xff]  ;;  %v717_v37 = vld [vmem:[%s994_s0 + $0x18] sm:$0xf0] }
   0xc   :  { %442 = vmatpush.bf16.msra.mxu2 %v745_v10  ;;  %v749_v27 = vld [vmem:[%s992_s1 + $0xc8] sm:$0xff]  ;;  %v748_v31 = vld [vmem:[%s992_s1 + $0xc0] sm:$0xff]  ;;  %v763_v40 = vld [vmem:[%s992_s1 + $0x138] sm:$0xff] }
   0xd   :  { %461 = vmatpush.bf16.msra.mxu3 %v753_v11  ;;  %v516_v32 = vld [vmem:[%s994_s0] sm:$0xf]  ;;  %v714_v34 = vld [vmem:[%s994_s0 + $0x4] sm:$0xf]  ;;  %v524_v36 = vld [vmem:[%s994_s0 + $0x8] sm:$0xf] }
   0xe   :  { %405 = vmatpush.bf16.msra.mxu0 %v728_v12  ;;  %v715_v38 = vld [vmem:[%s994_s0 + $0xc] sm:$0xf]  ;;  %v526_v39 = vld [vmem:[%s994_s0 + $0x1c] sm:$0xf0]  ;;  %v517_v41 = vor.u32 %v716_v33, %v516_v32  ;;  %v521_v42 = vor.u32 %v714_v34, %v518_v35  ;;  %v525_v43 = vor.u32 %v717_v37, %v524_v36  ;;  %v762_v45 = vld [vmem:[%s992_s1 + $0x130] sm:$0xff] }
   0xf   :  { %424 = vmatpush.bf16.msra.mxu1 %v736_v13  ;;  %v529_v44 = vor.u32 %v715_v38, %v526_v39  ;;  %v761_v46 = vld [vmem:[%s992_s1 + $0x128] sm:$0xff]  ;;  %v760_v47 = vld [vmem:[%s992_s1 + $0x120] sm:$0xff]  ;;  %v721_v49 = vld [vmem:[%s994_s0 + $0x38] sm:$0xf0] }
  0x10   :  { %443 = vmatpush.bf16.msra.mxu2 %v744_v14  ;;  %v536_v48 = vld [vmem:[%s994_s0 + $0x28] sm:$0xf]  ;;  %v719_v50 = vld [vmem:[%s994_s0 + $0x2c] sm:$0xf]  ;;  %v538_v51 = vld [vmem:[%s994_s0 + $0x3c] sm:$0xf0] }
  0x11   :  { %462 = vmatpush.bf16.msra.mxu3 %v752_v15  ;;  %v544_v52 = vld [vmem:[%s994_s0 + $0x30] sm:$0xf]  ;;  %v722_v53 = vld [vmem:[%s994_s0 + $0x40] sm:$0xf0]  ;;  %v720_v54 = vld [vmem:[%s994_s0 + $0x34] sm:$0xf]  ;;  %v537_v57 = vor.u32 %v721_v49, %v536_v48  ;;  %v541_v58 = vor.u32 %v719_v50, %v538_v51 }
  0x12   :  { %406 = vmatpush.bf16.msra.mxu0 %v727_v16  ;;  %v546_v55 = vld [vmem:[%s994_s0 + $0x44] sm:$0xf0]  ;;  %v759_v56 = vld [vmem:[%s992_s1 + $0x118] sm:$0xff]  ;;  %v545_v59 = vor.u32 %v722_v53, %v544_v52  ;;  %v758_v61 = vld [vmem:[%s992_s1 + $0x110] sm:$0xff] }
  0x13   :  { %425 = vmatpush.bf16.msra.mxu1 %v735_v17  ;;  %v549_v60 = vor.u32 %v720_v54, %v546_v55  ;;  %v757_v62 = vld [vmem:[%s992_s1 + $0x108] sm:$0xff]  ;;  %v756_v63 = vld [vmem:[%s992_s1 + $0x100] sm:$0xff]  ;;  %v532_v0 = vld [vmem:[%s994_s0 + $0x10] sm:$0xf] }
  0x14   :  { %444 = vmatpush.bf16.msra.mxu2 %v743_v18  ;;  %v718_v1 = vld [vmem:[%s994_s0 + $0x20] sm:$0xf0]  ;;  %v552_v2 = vld [vmem:[%s994_s0 + $0x38] sm:$0xf]  ;;  %v723_v3 = vld [vmem:[%s994_s0 + $0x48] sm:$0xf0] }
  0x15   :  { %463 = vmatpush.bf16.msra.mxu3 %v751_v19  ;;  %v533_v4 = vor.u32 %v718_v1, %v532_v0  ;;  %v553_v5 = vor.u32 %v723_v3, %v552_v2  ;;  %v772_v15 = vld [vmem:[%s993_s2] ss:$0 sm:$0xff] }
  0x16   :  { %407 = vmatpush.bf16.msra.mxu0 %v726_v20 }
  0x17   :  { %426 = vmatpush.bf16.msra.mxu1 %v734_v21 }
  0x18   :  { %445 = vmatpush.bf16.msra.mxu2 %v742_v22 }
  0x19   :  { %464 = vmatpush.bf16.msra.mxu3 %v750_v23 }
  0x1a   :  { %408 = vmatpush.bf16.msra.mxu0 %v725_v24 }
  0x1b   :  { %427 = vmatpush.bf16.msra.mxu1 %v733_v25 }
  0x1c   :  { %446 = vmatpush.bf16.msra.mxu2 %v741_v26 }
  0x1d   :  { %465 = vmatpush.bf16.msra.mxu3 %v749_v27 }
  0x1e   :  { %409 = vmatpush.bf16.msra.mxu0 %v724_v28 }
  0x1f   :  { %428 = vmatpush.bf16.msra.mxu1 %v732_v29 }
  0x20   :  { %447 = vmatpush.bf16.msra.mxu2 %v740_v30 }
  0x21   :  { %466 = vmatpush.bf16.msra.mxu3 %v748_v31  ;;  %410 = vmatmul.bf16.vlgmr.msra.gmra.mxu0 %v517_v41 }
  0x22   :  { %478 = vmatpush.bf16.msrb.mxu0 %v763_v40  ;;  %429 = vmatmul.bf16.vlgmr.msra.gmra.mxu1 %v521_v42 }
  0x23   :  { %764 = vmatpush.bf16.msrb.mxu1 %v763_v40  ;;  %448 = vmatmul.bf16.vlgmr.msra.gmra.mxu2 %v525_v43 }
  0x24   :  { %467 = vmatmul.bf16.vlgmr.msra.gmra.mxu3 %v529_v44 }
  0x26   :  { %479 = vmatpush.bf16.msrb.mxu0 %v762_v45 }
  0x27   :  { %765 = vmatpush.bf16.msrb.mxu1 %v762_v45 }
  0x2a   :  { %480 = vmatpush.bf16.msrb.mxu0 %v761_v46 }
  0x2b   :  { %766 = vmatpush.bf16.msrb.mxu1 %v761_v46 }
  0x2e   :  { %481 = vmatpush.bf16.msrb.mxu0 %v760_v47 }
  0x2f   :  { %767 = vmatpush.bf16.msrb.mxu1 %v760_v47 }
  0x31   :  { %415 = vmatmul.bf16.gmra.mxu0 %v537_v57 }
  0x32   :  { %482 = vmatpush.bf16.msrb.mxu0 %v759_v56  ;;  %434 = vmatmul.bf16.gmra.mxu1 %v541_v58 }
  0x33   :  { %768 = vmatpush.bf16.msrb.mxu1 %v759_v56  ;;  %453 = vmatmul.bf16.gmra.mxu2 %v545_v59 }
  0x34   :  { %472 = vmatmul.bf16.gmra.mxu3 %v549_v60 }
  0x36   :  { %483 = vmatpush.bf16.msrb.mxu0 %v758_v61 }
  0x37   :  { %769 = vmatpush.bf16.msrb.mxu1 %v758_v61 }
  0x3a   :  { %484 = vmatpush.bf16.msrb.mxu0 %v757_v62 }
  0x3b   :  { %770 = vmatpush.bf16.msrb.mxu1 %v757_v62 }
  0x3e   :  { %485 = vmatpush.bf16.msrb.mxu0 %v756_v63 }
  0x3f   :  { %771 = vmatpush.bf16.msrb.mxu1 %v756_v63 }
  0x41   :  { %486 = vmatmul.bf16.vlgmr.msrb.gmra.mxu0 %v533_v4 }
  0x42   :  { %491 = vmatmul.bf16.vlgmr.msrb.gmra.mxu1 %v553_v5 }
  0x9e   :  { %v411_v6 = vpop.f32.mrf.mxu0 }
  0x9f   :  { %v430_v7 = vpop.f32.mrf.mxu1  ;;  %v412_v17 = vadd.f32 %v772_v15, %v411_v6 }
  0xa1   :  { %v431_v22 = vadd.f32 %v430_v7, %v412_v17 }
  0xa6   :  { %v449_v8 = vpop.f32.mrf.mxu2  ;;  %v413_v10 = vpop.f32.mrf.mxu0 }
  0xa7   :  { %v468_v9 = vpop.f32.mrf.mxu3  ;;  %v432_v11 = vpop.f32.mrf.mxu1  ;;  %v450_v24 = vadd.f32 %v449_v8, %v431_v22  ;;  %v414_v27 = vadd.f32 %v772_v15, %v413_v10 }
  0xa9   :  { %v469_v29 = vadd.f32 %v468_v9, %v450_v24  ;;  %v433_v34 = vadd.f32 %v432_v11, %v414_v27 }
  0xae   :  { %v451_v12 = vpop.f32.mrf.mxu2  ;;  %v416_v13 = vpop.f32.mrf.mxu0 }
  0xaf   :  { %v435_v14 = vpop.f32.mrf.mxu1  ;;  %v470_v16 = vpop.f32.mrf.mxu3  ;;  %v417_v18 = vadd.f32 %v772_v15, %v416_v13  ;;  %v452_v38 = vadd.f32 %v451_v12, %v433_v34 }
  0xb1   :  { %v436_v23 = vadd.f32 %v435_v14, %v417_v18  ;;  %v471_v45 = vadd.f32 %v470_v16, %v452_v38 }
  0xb6   :  { %v454_v19 = vpop.f32.mrf.mxu2  ;;  %v418_v20 = vpop.f32.mrf.mxu0 }
  0xb7   :  { %v437_v21 = vpop.f32.mrf.mxu1  ;;  %v455_v25 = vadd.f32 %v454_v19, %v436_v23  ;;  %v473_v26 = vpop.f32.mrf.mxu3  ;;  %v419_v28 = vadd.f32 %v772_v15, %v418_v20 }
  0xb9   :  { %v474_v30 = vadd.f32 %v473_v26, %v455_v25  ;;  %v438_v35 = vadd.f32 %v437_v21, %v419_v28 }
  0xbe   :  { %v456_v31 = vpop.f32.mrf.mxu2  ;;  %v487_v32 = vpop.f32.mrf.mxu0 }
  0xbf   :  { %v492_v33 = vpop.f32.mrf.mxu1  ;;  %v488_v36 = vadd.f32 %v487_v32, %v469_v29  ;;  %v457_v39 = vadd.f32 %v456_v31, %v438_v35  ;;  %v475_v44 = vpop.f32.mrf.mxu3 }
  0xc0   :  { %v493_v37 = vadd.f32 %v492_v33, %v474_v30 }
  0xc1   :  { %v497_v40 = vmax.f32 %v488_v36, 0.0  ;;  %v476_v46 = vadd.f32 %v475_v44, %v457_v39 }
  0xc2   :  { %v499_v41 = vmax.f32 %v493_v37, 0.0 }
  0xc3   :  { %v501_v42 = vpack.c.bf16 %v497_v40, %v497_v40 }
  0xc4   :  { %v503_v43 = vpack.c.bf16 %v499_v41, %v499_v41 }
  0xc5   :  { %506 = vst.msk [vmem:[%s995_s3] sm:$0xf] %vm505_vm0, %v501_v42 }
  0xc6   :  { %508 = vst.msk [vmem:[%s995_s3 + $0x8] sm:$0xf] %vm505_vm0, %v503_v43  ;;  %v489_v47 = vpop.f32.mrf.mxu0 }
  0xc7   :  { %v494_v48 = vpop.f32.mrf.mxu1  ;;  %v490_v49 = vadd.f32 %v489_v47, %v471_v45 }
  0xc8   :  { %v495_v50 = vadd.f32 %v494_v48, %v476_v46 }
  0xc9   :  { %v498_v51 = vmax.f32 %v490_v49, 0.0 }
  0xca   :  { %v500_v52 = vmax.f32 %v495_v50, 0.0 }
  0xcb   :  { %v502_v53 = vpack.c.bf16 %v498_v51, %v498_v51 }
  0xcc   :  { %v504_v54 = vpack.c.bf16 %v500_v52, %v500_v52 }
  0xcd   :  { %507 = vst.msk [vmem:[%s995_s3 + $0x4] sm:$0xf] %vm505_vm0, %v502_v53 }
  0xce   :  { %509 = vst.msk [vmem:[%s995_s3 + $0xc] sm:$0xf] %vm505_vm0, %v504_v54 }

// kernel: spatial_path.5
= control target key start
LH: loop header
LB: loop body
LE: loop exit
PB: predicated region body
PF: predicated region fallthrough
CT: control target
= control target key end

     0   :  { %s827_s0 = inlined_call_operand.vmem [shape: bf16[8,640], index: 0, kind: input, shape index: {}]   ;;  %s828_s1 = inlined_call_operand.vmem [shape: bf16[640,128], index: 1, kind: input, shape index: {}]   ;;  %s829_s2 = inlined_call_operand.vmem [shape: f32[1,128], index: 2, kind: input, shape index: {}]   ;;  %s830_s3 = inlined_call_operand.hbm [shape: f32[8,128], index: 3, kind: output, shape index: {}]  }
   0x1   :  { %v610_v0 = vld [vmem:[%s828_s1 + $0x38] sm:$0xff]  ;;  %v609_v3 = vld [vmem:[%s828_s1 + $0x30] sm:$0xff]  ;;  %v608_v8 = vld [vmem:[%s828_s1 + $0x28] sm:$0xff] }
   0x2   :  { %v626_v1 = vld [vmem:[%s828_s1 + $0xb8] sm:$0xff]  ;;  %360 = vmatpush.bf16.msra.mxu0 %v610_v0  ;;  %v625_v5 = vld [vmem:[%s828_s1 + $0xb0] sm:$0xff]  ;;  %v624_v9 = vld [vmem:[%s828_s1 + $0xa8] sm:$0xff] }
   0x3   :  { %v634_v2 = vld [vmem:[%s828_s1 + $0xf8] sm:$0xff]  ;;  %386 = vmatpush.bf16.msra.mxu2 %v626_v1  ;;  %v633_v6 = vld [vmem:[%s828_s1 + $0xf0] sm:$0xff]  ;;  %v632_v10 = vld [vmem:[%s828_s1 + $0xe8] sm:$0xff] }
   0x4   :  { %v618_v4 = vld [vmem:[%s828_s1 + $0x78] sm:$0xff]  ;;  %399 = vmatpush.bf16.msra.mxu3 %v634_v2  ;;  %v617_v7 = vld [vmem:[%s828_s1 + $0x70] sm:$0xff]  ;;  %v616_v11 = vld [vmem:[%s828_s1 + $0x68] sm:$0xff] }
   0x5   :  { %373 = vmatpush.bf16.msra.mxu1 %v618_v4  ;;  %v607_v12 = vld [vmem:[%s828_s1 + $0x20] sm:$0xff] }
   0x6   :  { %361 = vmatpush.bf16.msra.mxu0 %v609_v3  ;;  %v623_v13 = vld [vmem:[%s828_s1 + $0xa0] sm:$0xff] }
   0x7   :  { %387 = vmatpush.bf16.msra.mxu2 %v625_v5  ;;  %v631_v14 = vld [vmem:[%s828_s1 + $0xe0] sm:$0xff] }
   0x8   :  { %400 = vmatpush.bf16.msra.mxu3 %v633_v6  ;;  %v615_v15 = vld [vmem:[%s828_s1 + $0x60] sm:$0xff] }
   0x9   :  { %374 = vmatpush.bf16.msra.mxu1 %v617_v7 }
   0xa   :  { %362 = vmatpush.bf16.msra.mxu0 %v608_v8 }
   0xb   :  { %388 = vmatpush.bf16.msra.mxu2 %v624_v9 }
   0xc   :  { %401 = vmatpush.bf16.msra.mxu3 %v632_v10 }
   0xd   :  { %375 = vmatpush.bf16.msra.mxu1 %v616_v11 }
   0xe   :  { %8 = vsyncpa [#allocation3], 0  ;;  %363 = vmatpush.bf16.msra.mxu0 %v607_v12  ;;  %v606_v16 = vld [vmem:[%s828_s1 + $0x18] sm:$0xff]  ;;  %v605_v20 = vld [vmem:[%s828_s1 + $0x10] sm:$0xff]  ;;  %s434_s21 = sshll.u32 %s830_s3, 4  ;;  %s435_s21 = int_to_ptr.hbm [resolvable:$true] %s434_s21 }
   0xf   :  { %389 = vmatpush.bf16.msra.mxu2 %v623_v13  ;;  %v622_v17 = vld [vmem:[%s828_s1 + $0x98] sm:$0xff]  ;;  %v621_v21 = vld [vmem:[%s828_s1 + $0x90] sm:$0xff]  ;;  %v604_v24 = vld [vmem:[%s828_s1 + $0x8] sm:$0xff] }
  0x10   :  { %402 = vmatpush.bf16.msra.mxu3 %v631_v14  ;;  %v630_v18 = vld [vmem:[%s828_s1 + $0xd8] sm:$0xff]  ;;  %v629_v22 = vld [vmem:[%s828_s1 + $0xd0] sm:$0xff]  ;;  %v15_v25 = vld [vmem:[%s827_s0] sm:$0xff] }
  0x11   :  { %376 = vmatpush.bf16.msra.mxu1 %v615_v15  ;;  %v614_v19 = vld [vmem:[%s828_s1 + $0x58] sm:$0xff]  ;;  %v613_v23 = vld [vmem:[%s828_s1 + $0x50] sm:$0xff]  ;;  %v620_v26 = vld [vmem:[%s828_s1 + $0x88] sm:$0xff]  ;;  %v105_v30 = vunpack.c.l.b16 %v15_v25  ;;  %v106_v38 = vunpack.c.h.b16 %v15_v25 }
  0x12   :  { %364 = vmatpush.bf16.msra.mxu0 %v606_v16  ;;  %v628_v27 = vld [vmem:[%s828_s1 + $0xc8] sm:$0xff]  ;;  %v603_v31 = vld [vmem:[%s828_s1] sm:$0xff]  ;;  %v642_v33 = vld [vmem:[%s828_s1 + $0x138] sm:$0xff] }
  0x13   :  { %390 = vmatpush.bf16.msra.mxu2 %v622_v17  ;;  %v16_v28 = vld [vmem:[%s827_s0 + $0x8] sm:$0xff]  ;;  %v619_v34 = vld [vmem:[%s828_s1 + $0x80] sm:$0xff]  ;;  %v110_v39 = vpack.c.b16 %v105_v30, %v105_v30  ;;  %v641_v41 = vld [vmem:[%s828_s1 + $0x130] sm:$0xff]  ;;  %v111_v43 = vpack.c.b16 %v106_v38, %v106_v38 }
  0x14   :  { %403 = vmatpush.bf16.msra.mxu3 %v630_v18  ;;  %v612_v29 = vld [vmem:[%s828_s1 + $0x48] sm:$0xff]  ;;  %v107_v32 = vunpack.c.l.b16 %v16_v28  ;;  %v108_v35 = vunpack.c.h.b16 %v16_v28  ;;  %v627_v36 = vld [vmem:[%s828_s1 + $0xc0] sm:$0xff]  ;;  %v638_v46 = vld [vmem:[%s828_s1 + $0x118] sm:$0xff] }
  0x15   :  { %377 = vmatpush.bf16.msra.mxu1 %v614_v19  ;;  %v611_v37 = vld [vmem:[%s828_s1 + $0x40] sm:$0xff]  ;;  %v640_v44 = vld [vmem:[%s828_s1 + $0x128] sm:$0xff]  ;;  %v637_v47 = vld [vmem:[%s828_s1 + $0x110] sm:$0xff] }
  0x16   :  { %365 = vmatpush.bf16.msra.mxu0 %v605_v20  ;;  %v112_v40 = vpack.c.b16 %v107_v32, %v107_v32  ;;  %v113_v42 = vpack.c.b16 %v108_v35, %v108_v35  ;;  %v639_v45 = vld [vmem:[%s828_s1 + $0x120] sm:$0xff]  ;;  %v636_v48 = vld [vmem:[%s828_s1 + $0x108] sm:$0xff]  ;;  %v17_v49 = vld [vmem:[%s827_s0 + $0x10] sm:$0xf]  ;;  %s671_s0 = smov [#allocation2]  }
  0x17   :  { %391 = vmatpush.bf16.msra.mxu2 %v621_v21  ;;  %v109_v50 = vunpack.c.l.b16 %v17_v49  ;;  %v635_v51 = vld [vmem:[%s828_s1 + $0x100] sm:$0xff]  ;;  %s432_s1 = sshll.u32 %s671_s0, 4  ;;  %s433_s1 = int_to_ptr.vmem [resolvable:$true] %s432_s1 }
  0x18   :  { %404 = vmatpush.bf16.msra.mxu3 %v629_v22  ;;  %v644_v59 = vld [vmem:[%s829_s2] ss:$0 sm:$0xff] }
  0x19   :  { %378 = vmatpush.bf16.msra.mxu1 %v613_v23  ;;  %v114_v52 = vpack.c.b16 %v109_v50, %v109_v50 }
  0x1a   :  { %366 = vmatpush.bf16.msra.mxu0 %v604_v24 }
  0x1b   :  { %392 = vmatpush.bf16.msra.mxu2 %v620_v26 }
  0x1c   :  { %405 = vmatpush.bf16.msra.mxu3 %v628_v27 }
  0x1d   :  { %379 = vmatpush.bf16.msra.mxu1 %v612_v29 }
  0x1e   :  { %367 = vmatpush.bf16.msra.mxu0 %v603_v31 }
  0x1f   :  { %393 = vmatpush.bf16.msra.mxu2 %v619_v34 }
  0x20   :  { %406 = vmatpush.bf16.msra.mxu3 %v627_v36 }
  0x21   :  { %380 = vmatpush.bf16.msra.mxu1 %v611_v37  ;;  %368 = vmatmul.bf16.vlgmr.msra.gmra.mxu0 %v110_v39 }
  0x22   :  { %412 = vmatpush.bf16.msrb.mxu0 %v642_v33  ;;  %394 = vmatmul.bf16.vlgmr.msra.gmra.mxu2 %v112_v40 }
  0x23   :  { %407 = vmatmul.bf16.vlgmr.msra.gmra.mxu3 %v113_v42 }
  0x24   :  { %381 = vmatmul.bf16.vlgmr.msra.gmra.mxu1 %v111_v43 }
  0x26   :  { %413 = vmatpush.bf16.msrb.mxu0 %v641_v41 }
  0x2a   :  { %414 = vmatpush.bf16.msrb.mxu0 %v640_v44 }
  0x2e   :  { %415 = vmatpush.bf16.msrb.mxu0 %v639_v45 }
  0x32   :  { %416 = vmatpush.bf16.msrb.mxu0 %v638_v46 }
  0x36   :  { %417 = vmatpush.bf16.msrb.mxu0 %v637_v47 }
  0x3a   :  { %418 = vmatpush.bf16.msrb.mxu0 %v636_v48 }
  0x3e   :  { %419 = vmatpush.bf16.msrb.mxu0 %v635_v51 }
  0x41   :  { %420 = vmatmul.bf16.vlgmr.msrb.gmra.mxu0 %v114_v52 }
  0x9e   :  { %v369_v53 = vpop.f32.mrf.mxu0 }
  0x9f   :  { %v370_v61 = vadd.f32 %v644_v59, %v369_v53 }
  0xa1   :  { %v382_v54 = vpop.f32.mrf.mxu1 }
  0xa2   :  { %v383_v63 = vadd.f32 %v382_v54, %v370_v61 }
  0xa5   :  { %v395_v55 = vpop.f32.mrf.mxu2 }
  0xa6   :  { %v371_v56 = vpop.f32.mrf.mxu0  ;;  %v408_v57 = vpop.f32.mrf.mxu3  ;;  %v396_v0 = vadd.f32 %v395_v55, %v383_v63 }
  0xa8   :  { %v409_v1 = vadd.f32 %v408_v57, %v396_v0 }
  0xa9   :  { %v384_v58 = vpop.f32.mrf.mxu1 }
  0xad   :  { %v397_v60 = vpop.f32.mrf.mxu2 }
  0xae   :  { %v410_v62 = vpop.f32.mrf.mxu3 }
  0xbe   :  { %v421_v2 = vpop.f32.mrf.mxu0 }
  0xbf   :  { %v422_v3 = vadd.f32 %v421_v2, %v409_v1 }
  0xc1   :  { %v425_v4 = vmax.f32 %v422_v3, 0.0 }
  0xc3   :  { %426 = vst [vmem:[#allocation2] sm:$0xff] %v425_v4 }
  0xc4   :  { %437 = dma.vmem_to_hbm [thread:$0]  %s433_s1, 128, %s435_s21, [#allocation3]  }
  0xc6   :  { %v423_v5 = vpop.f32.mrf.mxu0 }
  0xc7   :  { %669 = dma.done.wait [#allocation3], 128  }
  0xc8   :  { %670 = vsyncadd [#allocation3], 4294967168 }
  0xc9   :  { %442 = vsyncpa [#allocation3], 1 }

</bundles_post_ra>
